<compile_context>
chip_gen: v7x
topology: tpu7x:2x2x1
jax: 0.10.0
libtpu: 0.0.40
codegen_flags: <defaults>
</compile_context>

<pallas_src>
import functools

import jax
import jax.numpy as jnp
from jax import lax
from jax.experimental import pallas as pl
from jax.experimental.pallas import tpu as pltpu


def _mha_fused_kernel(q_ref, k_ref, v_ref, mask_ref, w_ref, b_ref, o_ref, *,
                      heads, head_dim, inv_scale, matmul_dtype):
    """One (batch, q-tile) step: per-head attention, concat, fused fc_out.

    Shapes (blocks):
      q_ref    : (1, tq, E)        k_ref/v_ref : (1, Lk, E)
      mask_ref : (1, mq, Lk)  mq in {1, tq}    (int32, 0 => masked)
      w_ref    : (E, E)  torch nn.Linear layout (out_features, in_features)
      b_ref    : (1, E)            o_ref       : (1, tq, E)  float32
    """
    # Scale q up-front: H*Lq*D multiplies instead of H*Lq*Lk on the energy.
    q = (q_ref[0].astype(jnp.float32) * jnp.float32(inv_scale)).astype(matmul_dtype)
    k = k_ref[0].astype(matmul_dtype)
    v = v_ref[0].astype(matmul_dtype)
    neg = mask_ref[0] == 0                                    # (mq, Lk)

    ctx = []
    for h in range(heads):                                    # static unroll
        sl = slice(h * head_dim, (h + 1) * head_dim)
        # scores (tq, Lk): contract head_dim; K consumed untransposed
        # (rhs contracting dim 1), so no XLU transpose feeds the MXU.
        s = lax.dot_general(q[:, sl], k[:, sl],
                            dimension_numbers=(((1,), (1,)), ((), ())),
                            preferred_element_type=jnp.float32)
        # masked_fill(mask == 0, -1e20); unscaled fill is still -inf-like.
        s = jnp.where(neg, jnp.float32(-1e20), s)
        # numerically stable softmax over keys, all f32; denom on the EUP.
        m = jnp.max(s, axis=-1, keepdims=True)
        e = jnp.exp(s - m)
        r = pl.reciprocal(jnp.sum(e, axis=-1, keepdims=True), approx=True)
        attn = (e * r).astype(matmul_dtype)
        # per-head context (tq, head_dim)
        ctx.append(lax.dot_general(attn, v[:, sl],
                                   dimension_numbers=(((1,), (0,)), ((), ())),
                                   preferred_element_type=jnp.float32))

    # Build the concat layout (tq, E) in VMEM (lane concat) so the fused fc is
    # ONE big-contraction matmul and the output store is a single dense slab.
    x = jnp.concatenate(ctx, axis=-1).astype(matmul_dtype)
    y = lax.dot_general(x, w_ref[...],                        # x @ W.T
                        dimension_numbers=(((1,), (1,)), ((), ())),
                        preferred_element_type=jnp.float32)
    o_ref[0] = (y + b_ref[...]).astype(o_ref.dtype)


def _pick_q_tile(q_len):
    """Whole q when small; otherwise MXU-edge-multiple tiles (512/256/128)."""
    if q_len <= 512:
        return q_len
    for t in (512, 256, 128, 64, 32, 16, 8):
        if q_len % t == 0:
            return t
    return q_len


def _vmem_limit_bytes():
    """Generation-aware scoped-VMEM budget with double-buffering headroom."""
    try:
        kind = jax.devices()[0].device_kind.lower()
    except Exception:
        kind = ""
    if "v7" in kind:
        return 48 * 1024 * 1024      # 64 MiB physical on v7x
    if "v5" in kind or "v6" in kind:
        return 96 * 1024 * 1024      # 128 MiB physical on v5e/v6e
    return 64 * 1024 * 1024


def multi_head_attention(values, keys, query, mask, fc_w, fc_b,
                         embed_size, heads, *, matmul_dtype=jnp.bfloat16):
    """Pallas port of MultiHeadAttention.forward (fc_out fused in-kernel)."""
    N, q_len, e_q = query.shape
    k_len = keys.shape[1]
    v_len = values.shape[1]
    assert k_len == v_len, "attention requires key_len == value_len"
    assert e_q == embed_size
    assert embed_size % heads == 0
    head_dim = embed_size // heads

    # Mask -> (N, mq, k_len) int32 with mq in {1, q_len}.  Per-head masks are
    # not supported (broadcast_to below fails loudly).
    if mask is None:
        mask_q = 1
        mask_i = jnp.ones((N, 1, k_len), jnp.int32)
    else:
        m = jnp.asarray(mask)
        mask_q = q_len if (m.ndim >= 2 and m.shape[-2] == q_len and q_len > 1) else 1
        m4 = jnp.broadcast_to(m, (N, 1, mask_q, k_len))
        mask_i = (m4[:, 0] != 0).astype(jnp.int32)

    inv_scale = 1.0 / (float(embed_size) ** 0.5)
    tq = _pick_q_tile(q_len)
    n_qt = q_len // tq

    # Parameters: weight pre-cast once (half-size resident block for bf16),
    # bias kept f32 for the f32 accumulate-and-add.
    fc_w_m = fc_w.astype(matmul_dtype)
    fc_b_2d = fc_b.reshape(1, embed_size).astype(jnp.float32)

    cparams = pltpu.CompilerParams(
        dimension_semantics=("parallel", "parallel"),
        vmem_limit_bytes=_vmem_limit_bytes(),
    )

    if mask_q == 1:
        mask_spec = pl.BlockSpec((1, 1, k_len), lambda n, qi: (n, 0, 0))
    else:
        mask_spec = pl.BlockSpec((1, tq, k_len), lambda n, qi: (n, qi, 0))

    out = pl.pallas_call(
        functools.partial(_mha_fused_kernel, heads=heads, head_dim=head_dim,
                          inv_scale=inv_scale, matmul_dtype=matmul_dtype),
        out_shape=jax.ShapeDtypeStruct((N, q_len, embed_size), jnp.float32),
        grid=(N, n_qt),
        in_specs=[
            pl.BlockSpec((1, tq, embed_size), lambda n, qi: (n, qi, 0)),
            # k/v/weight/bias blocks are q-tile-invariant -> fetched once per n
            # (weight/bias once per call).
            pl.BlockSpec((1, k_len, embed_size), lambda n, qi: (n, 0, 0)),
            pl.BlockSpec((1, v_len, embed_size), lambda n, qi: (n, 0, 0)),
            mask_spec,
            pl.BlockSpec((embed_size, embed_size), lambda n, qi: (0, 0)),
            pl.BlockSpec((1, embed_size), lambda n, qi: (0, 0)),
        ],
        out_specs=pl.BlockSpec((1, tq, embed_size), lambda n, qi: (n, qi, 0)),
        compiler_params=cparams,
    )(query, keys, values, mask_i, fc_w_m, fc_b_2d)

    return out


def _reference(values, keys, query, mask, fc_w, fc_b, embed_size, heads):
    """Pure-JAX transcription of the PyTorch forward pass for checking."""
    N, q_len, _ = query.shape
    k_len = keys.shape[1]
    head_dim = embed_size // heads
    v = values.reshape(N, -1, heads, head_dim)
    k = keys.reshape(N, k_len, heads, head_dim)
    q = query.reshape(N, q_len, heads, head_dim)
    energy = jnp.einsum("nqhd,nkhd->nhqk", q, k)
    energy = jnp.where(jnp.broadcast_to(mask, energy.shape) == 0, -1e20, energy)
    attn = jax.nn.softmax(energy / (embed_size ** 0.5), axis=3)
    out = jnp.einsum("nhql,nlhd->nqhd", attn, v).reshape(N, q_len, embed_size)
    return out @ fc_w.T + fc_b


if __name__ == "__main__":
    N, seq, embed_size, heads = 2, 8, 32, 4

    key = jax.random.PRNGKey(0)
    k1, k2, k3, k4, k5, k6 = jax.random.split(key, 6)
    values = jax.random.normal(k1, (N, seq, embed_size), jnp.float32)
    keys_in = jax.random.normal(k2, (N, seq, embed_size), jnp.float32)
    query = jax.random.normal(k3, (N, seq, embed_size), jnp.float32)

    # padding-style mask, broadcastable to (N, heads, q_len, k_len)
    mask = (jax.random.uniform(k4, (N, 1, 1, seq)) > 0.2).astype(jnp.float32)
    mask = mask.at[..., -1].set(1.0)  # guarantee at least one unmasked key

    # fc_out parameters (nn.Linear(embed_size, embed_size): W is (out, in))
    fc_w = jax.random.normal(k5, (embed_size, embed_size), jnp.float32) * 0.1
    fc_b = jax.random.normal(k6, (embed_size,), jnp.float32) * 0.1

    ref = _reference(values, keys_in, query, mask, fc_w, fc_b, embed_size, heads)

    # Default bf16 MXU path (f32 accumulation / softmax) — relaxed tolerance.
    out = multi_head_attention(values, keys_in, query, mask, fc_w, fc_b,
                               embed_size, heads)
    out = jax.block_until_ready(out)
    assert out.shape == (N, seq, embed_size)
    assert jnp.allclose(out, ref, atol=7.5e-2, rtol=7.5e-2), \
        "bf16 path mismatch vs reference"

    # Full-precision path — tolerance covers only the EUP approximate
    # reciprocal in the softmax denominator.
    out32 = multi_head_attention(values, keys_in, query, mask, fc_w, fc_b,
                                 embed_size, heads, matmul_dtype=jnp.float32)
    out32 = jax.block_until_ready(out32)
    assert jnp.allclose(out32, ref, atol=1e-2, rtol=1e-2), \
        "f32 path mismatch vs reference"

    print("KERNEL_OK")
</pallas_src>

<mosaic_0001>
module attributes {stable_mosaic.version = 11 : i64} {
  func.func @_mha_fused_kernel(%arg0: i32, %arg1: i32, %arg2: memref<1x8x32xf32, #tpu.memory_space<vmem>>, %arg3: memref<1x8x32xf32, #tpu.memory_space<vmem>>, %arg4: memref<1x8x32xf32, #tpu.memory_space<vmem>>, %arg5: memref<1x1x8xi32, #tpu.memory_space<vmem>>, %arg6: memref<32x32xbf16, #tpu.memory_space<vmem>>, %arg7: memref<1x32xf32, #tpu.memory_space<vmem>>, %arg8: memref<1x8x32xf32, #tpu.memory_space<vmem>>) attributes {dimension_semantics = [#tpu.dimension_semantics<parallel>, #tpu.dimension_semantics<parallel>], iteration_bounds = array<i64: 2, 1>, scalar_prefetch = 0 : i64, scratch_operands = 0 : i64, tpu.core_type = #tpu.core_type<tc>, window_params = [{transform_indices = @transform_0, window_bounds = array<i64: 1, 8, 32>}, {transform_indices = @transform_1, window_bounds = array<i64: 1, 8, 32>}, {transform_indices = @transform_2, window_bounds = array<i64: 1, 8, 32>}, {transform_indices = @transform_3, window_bounds = array<i64: 1, 1, 8>}, {pipeline_mode = #tpu.pipeline_mode<synchronous>, transform_indices = @transform_4, window_bounds = array<i64: 32, 32>}, {pipeline_mode = #tpu.pipeline_mode<synchronous>, transform_indices = @transform_5, window_bounds = array<i64: 1, 32>}, {transform_indices = @transform_6, window_bounds = array<i64: 1, 8, 32>}]} {
    %c0 = arith.constant 0 : index
    %c0_0 = arith.constant 0 : index
    %c0_1 = arith.constant 0 : index
    %0 = vector.load %arg2[%c0, %c0_0, %c0_1] : memref<1x8x32xf32, #tpu.memory_space<vmem>>, vector<1x8x32xf32>
    %1 = vector.shape_cast %0 : vector<1x8x32xf32> to vector<8x32xf32>
    %cst = arith.constant 0.176776692 : f32
    %2 = vector.broadcast %cst : f32 to vector<8x32xf32>
    %3 = arith.mulf %1, %2 : vector<8x32xf32>
    %4 = arith.truncf %3 : vector<8x32xf32> to vector<8x32xbf16>
    %c0_2 = arith.constant 0 : index
    %c0_3 = arith.constant 0 : index
    %c0_4 = arith.constant 0 : index
    %5 = vector.load %arg3[%c0_2, %c0_3, %c0_4] : memref<1x8x32xf32, #tpu.memory_space<vmem>>, vector<1x8x32xf32>
    %6 = vector.shape_cast %5 : vector<1x8x32xf32> to vector<8x32xf32>
    %7 = arith.truncf %6 : vector<8x32xf32> to vector<8x32xbf16>
    %c0_5 = arith.constant 0 : index
    %c0_6 = arith.constant 0 : index
    %c0_7 = arith.constant 0 : index
    %8 = vector.load %arg4[%c0_5, %c0_6, %c0_7] : memref<1x8x32xf32, #tpu.memory_space<vmem>>, vector<1x8x32xf32>
    %9 = vector.shape_cast %8 : vector<1x8x32xf32> to vector<8x32xf32>
    %10 = arith.truncf %9 : vector<8x32xf32> to vector<8x32xbf16>
    %c0_8 = arith.constant 0 : index
    %c0_9 = arith.constant 0 : index
    %c0_10 = arith.constant 0 : index
    %11 = vector.load %arg5[%c0_8, %c0_9, %c0_10] : memref<1x1x8xi32, #tpu.memory_space<vmem>>, vector<1x1x8xi32>
    %12 = vector.shape_cast %11 : vector<1x1x8xi32> to vector<1x8xi32>
    %c0_i32 = arith.constant 0 : i32
    %13 = vector.broadcast %c0_i32 : i32 to vector<1x8xi32>
    %14 = arith.cmpi eq, %12, %13 : vector<1x8xi32>
    %15 = vector.extract_strided_slice %4 {offsets = [0, 0], sizes = [8, 8], strides = [1, 1]} : vector<8x32xbf16> to vector<8x8xbf16>
    %16 = vector.extract_strided_slice %7 {offsets = [0, 0], sizes = [8, 8], strides = [1, 1]} : vector<8x32xbf16> to vector<8x8xbf16>
    %cst_11 = arith.constant dense<0.000000e+00> : vector<8x8xf32>
    %17 = tpu.matmul %15, %16, %cst_11 {dimension_numbers = #tpu.dot_dimension_numbers<[1], [1], [0], [0], [0, 0, 1, 0], [], []>} : vector<8x8xbf16>, vector<8x8xbf16>, vector<8x8xf32> -> vector<8x8xf32>
    %cst_12 = arith.constant -1.000000e+20 : f32
    %18 = vector.shape_cast %14 : vector<1x8xi1> to vector<1x8xi1>
    %19 = vector.broadcast %18 : vector<1x8xi1> to vector<8x8xi1>
    %20 = vector.broadcast %cst_12 : f32 to vector<8x8xf32>
    %21 = arith.select %19, %20, %17 : vector<8x8xi1>, vector<8x8xf32>
    %cst_13 = arith.constant dense<0xFF800000> : vector<8xf32>
    %22 = vector.multi_reduction <maximumf>, %21, %cst_13 [1] : vector<8x8xf32> to vector<8xf32>
    %23 = vector.shape_cast %22 : vector<8xf32> to vector<8x1xf32>
    %24 = vector.broadcast %23 : vector<8x1xf32> to vector<8x8xf32>
    %25 = arith.subf %21, %24 : vector<8x8xf32>
    %26 = math.exp %25 : vector<8x8xf32>
    %cst_14 = arith.constant dense<0.000000e+00> : vector<8xf32>
    %27 = vector.multi_reduction <add>, %26, %cst_14 [1] : vector<8x8xf32> to vector<8xf32>
    %28 = vector.shape_cast %27 : vector<8xf32> to vector<8x1xf32>
    %29 = tpu.reciprocal %28 {approx = true} : vector<8x1xf32> -> vector<8x1xf32>
    %30 = vector.broadcast %29 : vector<8x1xf32> to vector<8x8xf32>
    %31 = arith.mulf %26, %30 : vector<8x8xf32>
    %32 = arith.truncf %31 : vector<8x8xf32> to vector<8x8xbf16>
    %33 = vector.extract_strided_slice %10 {offsets = [0, 0], sizes = [8, 8], strides = [1, 1]} : vector<8x32xbf16> to vector<8x8xbf16>
    %cst_15 = arith.constant dense<0.000000e+00> : vector<8x8xf32>
    %34 = tpu.matmul %32, %33, %cst_15 {dimension_numbers = #tpu.dot_dimension_numbers<[1], [0], [0], [1], [0, 0, 1, 1], [], []>} : vector<8x8xbf16>, vector<8x8xbf16>, vector<8x8xf32> -> vector<8x8xf32>
    %35 = vector.extract_strided_slice %4 {offsets = [0, 8], sizes = [8, 8], strides = [1, 1]} : vector<8x32xbf16> to vector<8x8xbf16>
    %36 = vector.extract_strided_slice %7 {offsets = [0, 8], sizes = [8, 8], strides = [1, 1]} : vector<8x32xbf16> to vector<8x8xbf16>
    %cst_16 = arith.constant dense<0.000000e+00> : vector<8x8xf32>
    %37 = tpu.matmul %35, %36, %cst_16 {dimension_numbers = #tpu.dot_dimension_numbers<[1], [1], [0], [0], [0, 0, 1, 0], [], []>} : vector<8x8xbf16>, vector<8x8xbf16>, vector<8x8xf32> -> vector<8x8xf32>
    %cst_17 = arith.constant -1.000000e+20 : f32
    %38 = vector.shape_cast %14 : vector<1x8xi1> to vector<1x8xi1>
    %39 = vector.broadcast %38 : vector<1x8xi1> to vector<8x8xi1>
    %40 = vector.broadcast %cst_17 : f32 to vector<8x8xf32>
    %41 = arith.select %39, %40, %37 : vector<8x8xi1>, vector<8x8xf32>
    %cst_18 = arith.constant dense<0xFF800000> : vector<8xf32>
    %42 = vector.multi_reduction <maximumf>, %41, %cst_18 [1] : vector<8x8xf32> to vector<8xf32>
    %43 = vector.shape_cast %42 : vector<8xf32> to vector<8x1xf32>
    %44 = vector.broadcast %43 : vector<8x1xf32> to vector<8x8xf32>
    %45 = arith.subf %41, %44 : vector<8x8xf32>
    %46 = math.exp %45 : vector<8x8xf32>
    %cst_19 = arith.constant dense<0.000000e+00> : vector<8xf32>
    %47 = vector.multi_reduction <add>, %46, %cst_19 [1] : vector<8x8xf32> to vector<8xf32>
    %48 = vector.shape_cast %47 : vector<8xf32> to vector<8x1xf32>
    %49 = tpu.reciprocal %48 {approx = true} : vector<8x1xf32> -> vector<8x1xf32>
    %50 = vector.broadcast %49 : vector<8x1xf32> to vector<8x8xf32>
    %51 = arith.mulf %46, %50 : vector<8x8xf32>
    %52 = arith.truncf %51 : vector<8x8xf32> to vector<8x8xbf16>
    %53 = vector.extract_strided_slice %10 {offsets = [0, 8], sizes = [8, 8], strides = [1, 1]} : vector<8x32xbf16> to vector<8x8xbf16>
    %cst_20 = arith.constant dense<0.000000e+00> : vector<8x8xf32>
    %54 = tpu.matmul %52, %53, %cst_20 {dimension_numbers = #tpu.dot_dimension_numbers<[1], [0], [0], [1], [0, 0, 1, 1], [], []>} : vector<8x8xbf16>, vector<8x8xbf16>, vector<8x8xf32> -> vector<8x8xf32>
    %55 = vector.extract_strided_slice %4 {offsets = [0, 16], sizes = [8, 8], strides = [1, 1]} : vector<8x32xbf16> to vector<8x8xbf16>
    %56 = vector.extract_strided_slice %7 {offsets = [0, 16], sizes = [8, 8], strides = [1, 1]} : vector<8x32xbf16> to vector<8x8xbf16>
    %cst_21 = arith.constant dense<0.000000e+00> : vector<8x8xf32>
    %57 = tpu.matmul %55, %56, %cst_21 {dimension_numbers = #tpu.dot_dimension_numbers<[1], [1], [0], [0], [0, 0, 1, 0], [], []>} : vector<8x8xbf16>, vector<8x8xbf16>, vector<8x8xf32> -> vector<8x8xf32>
    %cst_22 = arith.constant -1.000000e+20 : f32
    %58 = vector.shape_cast %14 : vector<1x8xi1> to vector<1x8xi1>
    %59 = vector.broadcast %58 : vector<1x8xi1> to vector<8x8xi1>
    %60 = vector.broadcast %cst_22 : f32 to vector<8x8xf32>
    %61 = arith.select %59, %60, %57 : vector<8x8xi1>, vector<8x8xf32>
    %cst_23 = arith.constant dense<0xFF800000> : vector<8xf32>
    %62 = vector.multi_reduction <maximumf>, %61, %cst_23 [1] : vector<8x8xf32> to vector<8xf32>
    %63 = vector.shape_cast %62 : vector<8xf32> to vector<8x1xf32>
    %64 = vector.broadcast %63 : vector<8x1xf32> to vector<8x8xf32>
    %65 = arith.subf %61, %64 : vector<8x8xf32>
    %66 = math.exp %65 : vector<8x8xf32>
    %cst_24 = arith.constant dense<0.000000e+00> : vector<8xf32>
    %67 = vector.multi_reduction <add>, %66, %cst_24 [1] : vector<8x8xf32> to vector<8xf32>
    %68 = vector.shape_cast %67 : vector<8xf32> to vector<8x1xf32>
    %69 = tpu.reciprocal %68 {approx = true} : vector<8x1xf32> -> vector<8x1xf32>
    %70 = vector.broadcast %69 : vector<8x1xf32> to vector<8x8xf32>
    %71 = arith.mulf %66, %70 : vector<8x8xf32>
    %72 = arith.truncf %71 : vector<8x8xf32> to vector<8x8xbf16>
    %73 = vector.extract_strided_slice %10 {offsets = [0, 16], sizes = [8, 8], strides = [1, 1]} : vector<8x32xbf16> to vector<8x8xbf16>
    %cst_25 = arith.constant dense<0.000000e+00> : vector<8x8xf32>
    %74 = tpu.matmul %72, %73, %cst_25 {dimension_numbers = #tpu.dot_dimension_numbers<[1], [0], [0], [1], [0, 0, 1, 1], [], []>} : vector<8x8xbf16>, vector<8x8xbf16>, vector<8x8xf32> -> vector<8x8xf32>
    %75 = vector.extract_strided_slice %4 {offsets = [0, 24], sizes = [8, 8], strides = [1, 1]} : vector<8x32xbf16> to vector<8x8xbf16>
    %76 = vector.extract_strided_slice %7 {offsets = [0, 24], sizes = [8, 8], strides = [1, 1]} : vector<8x32xbf16> to vector<8x8xbf16>
    %cst_26 = arith.constant dense<0.000000e+00> : vector<8x8xf32>
    %77 = tpu.matmul %75, %76, %cst_26 {dimension_numbers = #tpu.dot_dimension_numbers<[1], [1], [0], [0], [0, 0, 1, 0], [], []>} : vector<8x8xbf16>, vector<8x8xbf16>, vector<8x8xf32> -> vector<8x8xf32>
    %cst_27 = arith.constant -1.000000e+20 : f32
    %78 = vector.shape_cast %14 : vector<1x8xi1> to vector<1x8xi1>
    %79 = vector.broadcast %78 : vector<1x8xi1> to vector<8x8xi1>
    %80 = vector.broadcast %cst_27 : f32 to vector<8x8xf32>
    %81 = arith.select %79, %80, %77 : vector<8x8xi1>, vector<8x8xf32>
    %cst_28 = arith.constant dense<0xFF800000> : vector<8xf32>
    %82 = vector.multi_reduction <maximumf>, %81, %cst_28 [1] : vector<8x8xf32> to vector<8xf32>
    %83 = vector.shape_cast %82 : vector<8xf32> to vector<8x1xf32>
    %84 = vector.broadcast %83 : vector<8x1xf32> to vector<8x8xf32>
    %85 = arith.subf %81, %84 : vector<8x8xf32>
    %86 = math.exp %85 : vector<8x8xf32>
    %cst_29 = arith.constant dense<0.000000e+00> : vector<8xf32>
    %87 = vector.multi_reduction <add>, %86, %cst_29 [1] : vector<8x8xf32> to vector<8xf32>
    %88 = vector.shape_cast %87 : vector<8xf32> to vector<8x1xf32>
    %89 = tpu.reciprocal %88 {approx = true} : vector<8x1xf32> -> vector<8x1xf32>
    %90 = vector.broadcast %89 : vector<8x1xf32> to vector<8x8xf32>
    %91 = arith.mulf %86, %90 : vector<8x8xf32>
    %92 = arith.truncf %91 : vector<8x8xf32> to vector<8x8xbf16>
    %93 = vector.extract_strided_slice %10 {offsets = [0, 24], sizes = [8, 8], strides = [1, 1]} : vector<8x32xbf16> to vector<8x8xbf16>
    %cst_30 = arith.constant dense<0.000000e+00> : vector<8x8xf32>
    %94 = tpu.matmul %92, %93, %cst_30 {dimension_numbers = #tpu.dot_dimension_numbers<[1], [0], [0], [1], [0, 0, 1, 1], [], []>} : vector<8x8xbf16>, vector<8x8xbf16>, vector<8x8xf32> -> vector<8x8xf32>
    %95 = tpu.concatenate %34, %54, %74, %94 in 1 : vector<8x8xf32>, vector<8x8xf32>, vector<8x8xf32>, vector<8x8xf32> -> vector<8x32xf32>
    %96 = arith.truncf %95 : vector<8x32xf32> to vector<8x32xbf16>
    %c0_31 = arith.constant 0 : index
    %c0_32 = arith.constant 0 : index
    %97 = vector.load %arg6[%c0_31, %c0_32] : memref<32x32xbf16, #tpu.memory_space<vmem>>, vector<32x32xbf16>
    %cst_33 = arith.constant dense<0.000000e+00> : vector<8x32xf32>
    %98 = tpu.matmul %96, %97, %cst_33 {dimension_numbers = #tpu.dot_dimension_numbers<[1], [1], [0], [0], [0, 0, 1, 0], [], []>} : vector<8x32xbf16>, vector<32x32xbf16>, vector<8x32xf32> -> vector<8x32xf32>
    %c0_34 = arith.constant 0 : index
    %c0_35 = arith.constant 0 : index
    %99 = vector.load %arg7[%c0_34, %c0_35] : memref<1x32xf32, #tpu.memory_space<vmem>>, vector<1x32xf32>
    %100 = vector.broadcast %99 : vector<1x32xf32> to vector<8x32xf32>
    %101 = arith.addf %98, %100 : vector<8x32xf32>
    %c0_36 = arith.constant 0 : index
    %c0_37 = arith.constant 0 : index
    %c0_38 = arith.constant 0 : index
    %102 = vector.load %arg8[%c0_36, %c0_37, %c0_38] : memref<1x8x32xf32, #tpu.memory_space<vmem>>, vector<1x8x32xf32>
    %103 = vector.shape_cast %102 : vector<1x8x32xf32> to vector<8x32xf32>
    %104 = vector.shape_cast %101 : vector<8x32xf32> to vector<1x8x32xf32>
    tpu.vector_store %arg8[%c0_36, %c0_37, %c0_38], %104 {strides = array<i32>} : memref<1x8x32xf32, #tpu.memory_space<vmem>>, vector<1x8x32xf32>,
    return
  }
  func.func @transform_0(%arg0: i32, %arg1: i32) -> (i32, i32, i32) {
    %c0_i32 = arith.constant 0 : i32
    %c0_i32_0 = arith.constant 0 : i32
    return %arg0, %arg1, %c0_i32 : i32, i32, i32
  }
  func.func @transform_1(%arg0: i32, %arg1: i32) -> (i32, i32, i32) {
    %c0_i32 = arith.constant 0 : i32
    %c0_i32_0 = arith.constant 0 : i32
    %c0_i32_1 = arith.constant 0 : i32
    return %arg0, %c0_i32, %c0_i32_0 : i32, i32, i32
  }
  func.func @transform_2(%arg0: i32, %arg1: i32) -> (i32, i32, i32) {
    %c0_i32 = arith.constant 0 : i32
    %c0_i32_0 = arith.constant 0 : i32
    %c0_i32_1 = arith.constant 0 : i32
    return %arg0, %c0_i32, %c0_i32_0 : i32, i32, i32
  }
  func.func @transform_3(%arg0: i32, %arg1: i32) -> (i32, i32, i32) {
    %c0_i32 = arith.constant 0 : i32
    %c0_i32_0 = arith.constant 0 : i32
    %c0_i32_1 = arith.constant 0 : i32
    return %arg0, %c0_i32, %c0_i32_0 : i32, i32, i32
  }
  func.func @transform_4(%arg0: i32, %arg1: i32) -> (i32, i32) {
    %c0_i32 = arith.constant 0 : i32
    %c0_i32_0 = arith.constant 0 : i32
    %c0_i32_1 = arith.constant 0 : i32
    return %c0_i32, %c0_i32_0 : i32, i32
  }
  func.func @transform_5(%arg0: i32, %arg1: i32) -> (i32, i32) {
    %c0_i32 = arith.constant 0 : i32
    %c0_i32_0 = arith.constant 0 : i32
    %c0_i32_1 = arith.constant 0 : i32
    return %c0_i32, %c0_i32_0 : i32, i32
  }
  func.func @transform_6(%arg0: i32, %arg1: i32) -> (i32, i32, i32) {
    %c0_i32 = arith.constant 0 : i32
    %c0_i32_0 = arith.constant 0 : i32
    return %arg0, %arg1, %c0_i32 : i32, i32, i32
  }
}

</mosaic_0001>

<bundles_post_ra>
// kernel: tpu_custom_call.1
= control target key start
LH: loop header
LB: loop body
LE: loop exit
PB: predicated region body
PF: predicated region fallthrough
CT: control target
= control target key end

     0   :  { %s2126_s0 = inlined_call_operand.hbm [shape: f32[2,8,32], index: 0, kind: input, shape index: {}]   ;;  %s2127_s1 = inlined_call_operand.hbm [shape: f32[2,8,32], index: 1, kind: input, shape index: {}]   ;;  %s2128_s2 = inlined_call_operand.hbm [shape: f32[2,8,32], index: 2, kind: input, shape index: {}]   ;;  %s2129_s3 = inlined_call_operand.hbm [shape: s32[2,1,8], index: 3, kind: input, shape index: {}]   ;;  %s2130_s4 = inlined_call_operand.hbm [shape: bf16[32,32], index: 4, kind: input, shape index: {}]   ;;  %s2131_s5 = inlined_call_operand.hbm [shape: f32[1,32], index: 5, kind: input, shape index: {}]   ;;  %s2132_s6 = inlined_call_operand.hbm [shape: f32[2,8,32], index: 6, kind: output, shape index: {}]  }
   0x1   :  { %2149 = sst [smem:[#allocation25_spill]] %s2127_s1 }
   0x2   :  { %2150 = sst [smem:[#allocation26_spill]] %s2130_s4 }
   0x3   :  { %11 = vsyncpa [#allocation3], 0 }
   0x4   :  { %13 = vsyncpa [#allocation3 + $0x1], 0 }
   0x5   :  { %14 = vsyncpa [#allocation6], 0 }
   0x6   :  { %16 = vsyncpa [#allocation6 + $0x1], 0 }
   0x7   :  { %17 = vsyncpa [#allocation9], 0 }
   0x8   :  { %19 = vsyncpa [#allocation9 + $0x1], 0 }
   0x9   :  { %20 = vsyncpa [#allocation12], 0 }
   0xa   :  { %21 = vsyncpa [#allocation4], 0 }
   0xb   :  { %23 = vsyncpa [#allocation4 + $0x1], 0  ;;  %s1709_s21 = smov 0   ;;  %s1711_s22 = smov 0  }
   0xc   :  { %s1713_s23 = smov 0   ;;  %s1715_s24 = smov 0  }
   0xd   :  { %s1717_s25 = smov 0   ;;  %s1719_s26 = smov 0  }
   0xe LB: > { %2151 = sst [smem:[#allocation20_spill]] %s1634_s21  ;;  %s1740_s27 = sadd.s32 4294967295, %s1654_s26   ;;  %s1654_s26 = sphi %s1719_s26, %s29_s26   ;;  %s1650_s25 = sphi %s1717_s25, %s2191_s25   ;;  %s1646_s24 = sphi %s1715_s24, %s2190_s24   ;;  %s1642_s23 = sphi %s1713_s23, %s2186_s23   ;;  %s1638_s22 = sphi %s1711_s22, %s2189_s22   ;;  %s1634_s21 = sphi %s1709_s21, %s2188_s21  }
   0xf   : > { %2152 = sst [smem:[#allocation21_spill]] %s1642_s23  ;;  %s1143_s28 = sadd.s32 4294967294, %s1654_s26  }
  0x10   : > { %p63_p0 = scmp.ne.s32.totalorder %s1638_s22, %s1634_s21  ;;  %p2133_p1 = scmp.eq.s32.totalorder %s1740_s27, 0 }
  0x11   : > { %p215_p3 = scmp.eq.s32.totalorder %s1143_s28, 1  ;;  %p1144_p5 = scmp.ge.s32.totalorder %s1654_s26, 1 }
  0x12   : > { %p1749_p4 = por %p2133_p1, %p63_p0  ;;  %p222_p7 = scmp.lt.s32.totalorder %s1654_s26, 3 }
  0x13   : > { %p1754_p6 = por %p215_p3, %p63_p0  ;;  %s1656_s8 = smov [#allocation10]  }
  0x14   : > { %s2153_s29 = scalar_select %p1749_p4, 1, 0 }
  0x15   : > { %s2154_s30 = scalar_select %p1754_p6, 1, 0 }
  0x16   : > { %p1759_p8 = pnand %p1144_p5, %p222_p7  ;;  %s234_s9 = sshll.u32 %s1656_s8, 4  ;;  %s235_s9 = int_to_ptr.vmem [resolvable:$true] %s234_s9 }
  0x17   : > { %2155 = sst [smem:[#allocation22_spill]] %s2154_s30  ;;  %s41_s11 = sadd.s32 1, %s1650_s25 }
  0x18   : > { %s2156_s7 = scalar_select %p1759_p8, 1, 0 }
  0x19   : > { %p1271_p9 = pneg %p1759_p8  ;;  %s2158_s4 = sld [smem:[#allocation26_spill]] }
  0x1b   : > { %p1768_p11 = pnand %p1271_p9, %p2133_p1 }
  0x1d   : > { %s2157_s10 = scalar_select %p1768_p11, 1, 0 }
  0x1e   : > { %p2140_p13 = pneg %p1768_p11 }
  0x1f   : > { %s1380_s14 = scalar_lea.hbm %s2158_s4, 256 }
  0x20   : > { %p1381_p12 = scmp.ne.s32.totalorder %s2158_s4, %s1380_s14  ;;  %p1387_p5 = scmp.lt.u32.totalorder %s1380_s14, %s2158_s4 }
  0x22   : > { %p1383_p0 = pnand %p2140_p13, %p1381_p12 }
  0x24   : > { %p1384_p3 = pneg %p1383_p0 }
  0x26   : > { %p1389_p7 = pnand %p1387_p5, %p1384_p3 }
  0x28   : > { %1392 = shalt.err (!%p1389_p7)
}
  0x29   : > { %s1393_s19 = scalar_lea.vmem %s235_s9, 256  ;;  %p1401_p2 = scmp.lt.s32.totalorder %s235_s9, %s235_s9 }
  0x2a   : > { %p1394_p9 = scmp.ne.s32.totalorder %s235_s9, %s1393_s19  ;;  %p1402_p6 = scmp.lt.s32.totalorder %s1393_s19, %s1393_s19 }
  0x2c   : > { %p1396_p10 = pnand %p1394_p9, %p2140_p13  ;;  %p1403_p4 = por %p1402_p6, %p1401_p2 }
  0x2e   : > { %p1397_p1 = pneg %p1396_p10 }
  0x30   : > { %p1404_p8 = pnand %p1403_p4, %p1397_p1 }
  0x32   : > { %1407 = shalt.err (!%p1404_p8)
}
  0x33   : > { %s1657_s20 = smov 64   ;;  %s1658_s28 = smov 4  }
  0x34   : > { %1274 = dma.hbm_to_vmem [thread:$0]  (!%p1768_p11), %s2158_s4, 256, %s235_s9, [#allocation9], %s1657_s20, %s1657_s20, %s1658_s28  }
  0x35   : > { %p43_p1 = scmp.ge.s32.totalorder %s41_s11, 2  ;;  %s50_s13 = sadd.s32 1, %s1642_s23 }
  0x36   : > { %p57_p2 = scmp.ne.s32.totalorder %s1642_s23, %s1638_s22  ;;  %p58_p4 = scmp.eq.s32.totalorder %s1654_s26, 0 }
  0x37   : > { %s2193_s11 = smov (%p43_p1, %s41_s11), 0  ;;  %p2160_p8 = scmp.eq.s32.totalorder %s1740_s27, 1 }
  0x38   : > { %2159 = sst [smem:[#allocation23_spill]] %s2193_s11  ;;  %p59_p6 = por %p58_p4, %p57_p2 }
  0x39   : > { %p1803_p10 = por %p2160_p8, %p57_p2  ;;  %s45_s15 = ssub.s32 %s1650_s25, %s2193_s11 }
  0x3a   : > { %p1297_p12 = scmp.lt.s32.totalorder %s1654_s26, 2  ;;  %p48_p0 = scmp.eq.s32.totalorder %s45_s15, 0 }
  0x3b   : > { %s2161_s14 = scalar_select %p1803_p10, 1, 0 }
  0x3c   : > { %s1811_s16 = sand.u32 1, %s1642_s23   ;;  %s1817_s17 = sshll.u32 %s1650_s25, 7 }
  0x3d   : > { %s1814_s9 = sshll.u32 %s1811_s16, 3  ;;  %p1822_p3 = pnand %p1297_p12, %p59_p6 }
  0x3e   : > { %s1820_s18 = scalar_select %p48_p0, %s1642_s23, %s50_s13  }
  0x3f   : > { %s2163_s19 = scalar_select %p1822_p3, 1, 0 }
  0x40   : > { %2162 = sst [smem:[#allocation24_spill]] %s1820_s18  ;;  %s2139_s20 = sand.u32 1, %s1654_s26  }
  0x41   : > { %s2164_s1 = sld [smem:[#allocation25_spill]]  ;;  %s282_s15 = scalar_lea.vmem [#allocation5], %s1814_s9 }
  0x42   : > { %s289_s4 = sshll.u32 %s282_s15, 4  ;;  %s1838_s13 = scalar_lea.sflag [#allocation6], %s2139_s20  ;;  %s1834_s4 = int_to_ptr.vmem [resolvable:$true] %s289_s4 }
  0x43   : > { %p1844_p7 = pneg %p1822_p3 }
  0x45   : > { %s2165_s18 = scalar_select %p1844_p7, 1, 0 }
  0x47   : > { %s1831_s12 = scalar_lea.hbm %s2164_s1, %s1817_s17  ;;  %s1413_s15 = scalar_lea.hbm %s2164_s1, 256 }
  0x48   : > { %s1408_s11 = scalar_lea.hbm %s1831_s12, 128  ;;  %p1414_p2 = scmp.lt.u32.totalorder %s1831_s12, %s2164_s1 }
  0x49   : > { %p1409_p5 = scmp.ne.s32.totalorder %s1831_s12, %s1408_s11  ;;  %p1415_p4 = scmp.lt.u32.totalorder %s1413_s15, %s1408_s11 }
  0x4a   : > { %p1417_p8 = scmp.lt.u32.totalorder %s1408_s11, %s1831_s12 }
  0x4b   : > { %p1411_p9 = pnand %p1844_p7, %p1409_p5  ;;  %p1416_p6 = por %p1415_p4, %p1414_p2 }
  0x4d   : > { %p1412_p1 = pneg %p1411_p9  ;;  %p1418_p12 = por %p1417_p8, %p1416_p6 }
  0x4f   : > { %p1419_p0 = pnand %p1418_p12, %p1412_p1 }
  0x51   : > { %1422 = shalt.err (!%p1419_p0)
}
  0x52   : > { %s1423_s20 = scalar_lea.vmem %s1834_s4, 128  ;;  %s1659_s28 = smov [#allocation5]  }
  0x53   : > { %p1424_p5 = scmp.ne.s32.totalorder %s1834_s4, %s1423_s20  ;;  %s1428_s8 = sshll.u32 %s1659_s28, 4  ;;  %s1429_s8 = int_to_ptr.vmem [resolvable:$false] %s1428_s8 }
  0x54   : > { %s1430_s23 = scalar_lea.vmem %s1429_s8, 256  ;;  %p1431_p10 = scmp.lt.s32.totalorder %s1834_s4, %s1429_s8 }
  0x55   : > { %p1426_p9 = pnand %p1424_p5, %p1844_p7  ;;  %p1432_p11 = scmp.lt.s32.totalorder %s1430_s23, %s1423_s20 }
  0x57   : > { %p1427_p13 = pneg %p1426_p9  ;;  %p1433_p2 = por %p1432_p11, %p1431_p10 }
  0x59   : > { %p1434_p4 = pnand %p1433_p2, %p1427_p13 }
  0x5b   : > { %1437 = shalt.err (!%p1434_p4)
}
  0x5c   : > { %1284 = dma.hbm_to_vmem [thread:$0]  (!%p1822_p3), %s1831_s12, 128, %s1834_s4, %s1838_s13  }
  0x5d   : > { %s1660_s30 = smov [#allocation11]   ;;  %s1438_s28 = scalar_lea.hbm %s2131_s5, 16 }
  0x5e   : > { %s248_s11 = sshll.u32 %s1660_s30, 4  ;;  %p1439_p11 = scmp.ne.s32.totalorder %s2131_s5, %s1438_s28  ;;  %s249_s11 = int_to_ptr.vmem [resolvable:$true] %s248_s11 }
  0x5f   : > { %p2166_p13 = scmp.ne.s32.totalorder %s2157_s10, 0  ;;  %p1445_p8 = scmp.lt.u32.totalorder %s1438_s28, %s2131_s5 }
  0x61   : > { %p2167_p10 = pneg %p2166_p13 }
  0x63   : > { %p1441_p1 = pnand %p1439_p11, %p2167_p10 }
  0x65   : > { %p1442_p6 = pneg %p1441_p1 }
  0x67   : > { %p1447_p12 = pnand %p1445_p8, %p1442_p6 }
  0x69   : > { %1450 = shalt.err (!%p1447_p12)
}
  0x6a   : > { %s1451_s4 = scalar_lea.vmem %s249_s11, 16  ;;  %p2168_p5 = pmov %p2167_p10 }
  0x6b   : > { %p1452_p0 = scmp.ne.s32.totalorder %s249_s11, %s1451_s4  ;;  %s1458_s1 = scalar_lea.vmem %s249_s11, 32 }
  0x6c   : > { %p1459_p4 = scmp.lt.s32.totalorder %s249_s11, %s249_s11  ;;  %p1460_p3 = scmp.lt.s32.totalorder %s1458_s1, %s1451_s4 }
  0x6d   : > { %p1454_p9 = pnand %p1452_p0, %p2168_p5 }
  0x6e   : > { %p1461_p7 = por %p1460_p3, %p1459_p4 }
  0x6f   : > { %p1455_p2 = pneg %p1454_p9 }
  0x71   : > { %p1462_p10 = pnand %p1461_p7, %p1455_p2 }
  0x73   : > { %1465 = shalt.err (!%p1462_p10)
}
  0x74   : > { %1277 = dma.hbm_to_vmem [thread:$0]  (!%p2166_p13), %s2131_s5, 16, %s249_s11, [#allocation12]  }
  0x75   : > { %s1892_s28 = scalar_lea.hbm %s2126_s0, %s1817_s17  ;;  %s263_s8 = scalar_lea.vmem [#allocation2], %s1814_s9 }
  0x76   : > { %s271_s20 = sshll.u32 %s263_s8, 4  ;;  %s260_s10 = scalar_lea.sflag [#allocation3], %s1811_s16  ;;  %s272_s20 = int_to_ptr.vmem [resolvable:$true] %s271_s20 }
  0x77   : > { %s1466_s23 = scalar_lea.hbm %s1892_s28, 128  ;;  %p2169_p7 = scmp.ne.s32.totalorder %s2165_s18, 0 }
  0x78   : > { %p1467_p3 = scmp.ne.s32.totalorder %s1892_s28, %s1466_s23  ;;  %s1471_s1 = scalar_lea.hbm %s2126_s0, 256 }
  0x79   : > { %p1472_p13 = scmp.lt.u32.totalorder %s1892_s28, %s2126_s0  ;;  %p1473_p6 = scmp.lt.u32.totalorder %s1471_s1, %s1466_s23 }
  0x7a   : > { %p1469_p11 = pnand %p1467_p3, %p2169_p7  ;;  %p1475_p12 = scmp.lt.u32.totalorder %s1466_s23, %s1892_s28 }
  0x7b   : > { %p1474_p8 = por %p1473_p6, %p1472_p13 }
  0x7c   : > { %p1470_p1 = pneg %p1469_p11 }
  0x7d   : > { %p1476_p0 = por %p1475_p12, %p1474_p8 }
  0x7f   : > { %p1477_p5 = pnand %p1476_p0, %p1470_p1 }
  0x81   : > { %1480 = shalt.err (!%p1477_p5)
}
  0x82   : > { %s1481_s30 = scalar_lea.vmem %s272_s20, 128  ;;  %s1661_s15 = smov [#allocation2]  }
  0x83   : > { %p1482_p9 = scmp.ne.s32.totalorder %s272_s20, %s1481_s30  ;;  %s1486_s8 = sshll.u32 %s1661_s15, 4  ;;  %s1487_s8 = int_to_ptr.vmem [resolvable:$false] %s1486_s8 }
  0x84   : > { %s1488_s4 = scalar_lea.vmem %s1487_s8, 256  ;;  %p1489_p10 = scmp.lt.s32.totalorder %s272_s20, %s1487_s8 }
  0x85   : > { %p1484_p2 = pnand %p1482_p9, %p2169_p7  ;;  %p1490_p3 = scmp.lt.s32.totalorder %s1488_s4, %s1481_s30 }
  0x87   : > { %p1485_p4 = pneg %p1484_p2  ;;  %p1491_p11 = por %p1490_p3, %p1489_p10 }
  0x89   : > { %p1492_p6 = pnand %p1491_p11, %p1485_p4 }
  0x8b   : > { %1495 = shalt.err (!%p1492_p6)
}
  0x8c   : > { %p2170_p13 = scmp.ne.s32.totalorder %s2163_s19, 0  ;;  %s1917_s1 = scalar_lea.hbm %s2128_s2, %s1817_s17 }
  0x8d   : > { %s300_s21 = scalar_lea.vmem [#allocation7], %s1814_s9  ;;  %s1496_s30 = scalar_lea.hbm %s1917_s1, 128 }
  0x8e   : > { %1281 = dma.hbm_to_vmem [thread:$0]  (!%p2170_p13), %s1892_s28, 128, %s272_s20, %s260_s10  }
  0x8f   : > { %s307_s12 = sshll.u32 %s300_s21, 4  ;;  %p1497_p1 = scmp.ne.s32.totalorder %s1917_s1, %s1496_s30  ;;  %s308_s12 = int_to_ptr.vmem [resolvable:$true] %s307_s12 }
  0x90   : > { %s1501_s28 = scalar_lea.hbm %s2128_s2, 256  ;;  %p1502_p0 = scmp.lt.u32.totalorder %s1917_s1, %s2128_s2 }
  0x91   : > { %p1499_p8 = pnand %p1497_p1, %p2169_p7  ;;  %p1503_p5 = scmp.lt.u32.totalorder %s1501_s28, %s1496_s30 }
  0x92   : > { %p1505_p2 = scmp.lt.u32.totalorder %s1496_s30, %s1917_s1 }
  0x93   : > { %p1500_p12 = pneg %p1499_p8  ;;  %p1504_p9 = por %p1503_p5, %p1502_p0 }
  0x95   : > { %p1506_p4 = por %p1505_p2, %p1504_p9 }
  0x97   : > { %p1507_p10 = pnand %p1506_p4, %p1500_p12 }
  0x99   : > { %1510 = shalt.err (!%p1507_p10)
}
  0x9a   : > { %s1511_s9 = scalar_lea.vmem %s308_s12, 128  ;;  %s1662_s17 = smov [#allocation7]  }
  0x9b   : > { %p1512_p3 = scmp.ne.s32.totalorder %s308_s12, %s1511_s9  ;;  %s1516_s4 = sshll.u32 %s1662_s17, 4  ;;  %s1517_s4 = int_to_ptr.vmem [resolvable:$false] %s1516_s4 }
  0x9c   : > { %s1518_s23 = scalar_lea.vmem %s1517_s4, 256  ;;  %p1519_p1 = scmp.lt.s32.totalorder %s308_s12, %s1517_s4 }
  0x9d   : > { %p1514_p11 = pnand %p1512_p3, %p2169_p7  ;;  %p1520_p8 = scmp.lt.s32.totalorder %s1518_s23, %s1511_s9 }
  0x9f   : > { %p1515_p6 = pneg %p1514_p11  ;;  %p1521_p13 = por %p1520_p8, %p1519_p1 }
  0xa1   : > { %p1522_p0 = pnand %p1521_p13, %p1515_p6 }
  0xa3   : > { %1525 = shalt.err (!%p1522_p0)
}
  0xa4   : > { %p2171_p5 = scmp.ne.s32.totalorder %s2163_s19, 0  ;;  %s1154_s11 = sshll.u32 %s1650_s25, 4 }
  0xa5   : > { %s317_s21 = scalar_lea.vmem [#allocation8], %s1811_s16  ;;  %s1943_s28 = scalar_lea.hbm %s2129_s3, %s1154_s11 }
  0xa6   : > { %1287 = dma.hbm_to_vmem [thread:$0]  (!%p2171_p5), %s1917_s1, 128, %s308_s12, %s1838_s13  }
  0xa7   : > { %s324_s30 = sshll.u32 %s317_s21, 4  ;;  %s2172_s20 = sand.u32 1, %s1654_s26   ;;  %s325_s30 = int_to_ptr.vmem [resolvable:$true] %s324_s30 }
  0xa8   : > { %s315_s10 = scalar_lea.sflag [#allocation9], %s2172_s20  ;;  %s1526_s9 = scalar_lea.hbm %s1943_s28, 16 }
  0xa9   : > { %p1527_p13 = scmp.ne.s32.totalorder %s1943_s28, %s1526_s9  ;;  %s1531_s1 = scalar_lea.hbm %s2129_s3, 32 }
  0xaa   : > { %p1532_p2 = scmp.lt.u32.totalorder %s1943_s28, %s2129_s3  ;;  %p1533_p4 = scmp.lt.u32.totalorder %s1531_s1, %s1526_s9 }
  0xab   : > { %p1529_p12 = pnand %p1527_p13, %p2169_p7  ;;  %p1535_p3 = scmp.lt.u32.totalorder %s1526_s9, %s1943_s28 }
  0xac   : > { %p1534_p10 = por %p1533_p4, %p1532_p2 }
  0xad   : > { %p1530_p9 = pneg %p1529_p12 }
  0xae   : > { %p1536_p11 = por %p1535_p3, %p1534_p10 }
  0xb0   : > { %p1537_p6 = pnand %p1536_p11, %p1530_p9 }
  0xb2   : > { %1540 = shalt.err (!%p1537_p6)
}
  0xb3   : > { %s1541_s4 = scalar_lea.vmem %s325_s30, 16  ;;  %s1663_s23 = smov [#allocation8]  }
  0xb4   : > { %p1542_p1 = scmp.ne.s32.totalorder %s325_s30, %s1541_s4  ;;  %s1546_s11 = sshll.u32 %s1663_s23, 4  ;;  %s1547_s11 = int_to_ptr.vmem [resolvable:$false] %s1546_s11 }
  0xb5   : > { %s1548_s21 = scalar_lea.vmem %s1547_s11, 32  ;;  %p1549_p13 = scmp.lt.s32.totalorder %s325_s30, %s1547_s11 }
  0xb6   : > { %p1544_p8 = pnand %p1542_p1, %p2169_p7  ;;  %p1550_p12 = scmp.lt.s32.totalorder %s1548_s21, %s1541_s4 }
  0xb8   : > { %p1545_p0 = pneg %p1544_p8  ;;  %p1551_p5 = por %p1550_p12, %p1549_p13 }
  0xba   : > { %p1552_p2 = pnand %p1551_p5, %p1545_p0 }
  0xbc   : > { %1555 = shalt.err (!%p1552_p2)
}
  0xbd   : > { %p2173_p4 = scmp.ne.s32.totalorder %s2163_s19, 0  ;;  %p2174_p9 = scmp.ne.s32.totalorder %s2156_s7, 0 }
  0xbe   : > { %s1967_s18 = sand.u32 (!%p2174_p9), 1, %s1638_s22   ;;  %p2175_p7 = scmp.ne.s32.totalorder (!%p2174_p9), %s2153_s29, 0 }
  0xbf   : > { %1290 = dma.hbm_to_vmem [thread:$0]  (!%p2173_p4), %s1943_s28, 16, %s325_s30, %s315_s10  }
  0xc0   : > { %333 = sbr.rel (%p2174_p9) target bundleno = 1442 (0x5a2), region = 44  ;;  %s1970_s15 = sshll.u32 (!%p2174_p9), %s1967_s18, 3 }
  0xc1   : > { %s336_s8 = scalar_lea.sflag (!%p2174_p9), [#allocation3], %s1967_s18  ;;  %s339_s20 = scalar_lea.vmem (!%p2174_p9), [#allocation2], %s1970_s15 }
  0xc7   : > { %1609 = dma.done.wait (%p2175_p7), %s336_s8, 128  }
  0xc8   : > { %1611 = vsyncadd (%p2175_p7), %s336_s8, 4294967168  ;;  %s344_s7 = sand.u32 1, %s1740_s27   ;;  %s348_s30 = scalar_lea.vmem [#allocation5], %s1970_s15 }
  0xc9   : > { %s345_s19 = scalar_lea.sflag [#allocation6], %s344_s7 }
  0xca   : > { %1613 = dma.done.wait (%p2175_p7), %s345_s19, 256  }
  0xcb   : > { %1615 = vsyncadd (%p2175_p7), %s345_s19, 4294967040  ;;  %s357_s28 = scalar_lea.vmem [#allocation7], %s1970_s15  ;;  %s363_s10 = scalar_lea.sflag [#allocation9], %s344_s7 }
  0xcc   : > { %s365_s9 = scalar_lea.vmem [#allocation8], %s1967_s18 }
  0xcd   : > { %1617 = dma.done.wait (%p2175_p7), %s363_s10, 16  }
  0xce   : > { %1619 = vsyncadd (%p2175_p7), %s363_s10, 4294967280  ;;  %p2176_p5 = scmp.eq.s32.totalorder %s1740_s27, 0 }
  0xd0   : > { %1621 = dma.done.wait (%p2176_p5), [#allocation9], 256   ;;  %p2177_p10 = pmov %p2176_p5 }
  0xd1   : > { %p2178_p3 = pmov %p2176_p5 }
  0xd2   : > { %1623 = vsyncadd (%p2177_p10), [#allocation9], 4294967040 }
  0xd3   : > { %1625 = dma.done.wait (%p2178_p3), [#allocation12], 16   ;;  %p2179_p11 = pmov %p2178_p3 }
  0xd4   : > { %v1664_v0 = vmov 0.0   ;;  %vm1665_vm0 = vmmov 0   ;;  %v420_v1 = vld [vmem:[%s348_s30] sm:$0xff]  ;;  %vm426_vm1 = vcmask 64512   ;;  %v417_v2 = vld [vmem:[%s339_s20] sm:$0xff]  ;;  %s1666_s29 = smov 120   ;;  %v474_v16 = vlaneseq }
  0xd5   : > { %1627 = vsyncadd (%p2179_p11), [#allocation12], 4294967280  ;;  %1197 = vmatprep.subr.bf16.mxu0 %v1664_v0  ;;  %1199 = vmatprep.mubr.msk.bf16.mxu0 %vm1665_vm0, %v1664_v0  ;;  %v421_v3 = vpack.c.bf16 %v420_v1, %v420_v1  ;;  %v418_v4 = vmul.f32 0.17677669, %v417_v2  ;;  %s1667_s27 = smov 112   ;;  %s1668_s13 = smov 104  }
  0xd6   : > { %1209 = vmatprep.subr.bf16.mxu1 %v1664_v0  ;;  %1211 = vmatprep.mubr.msk.bf16.mxu1 %vm1665_vm0, %v1664_v0  ;;  %v424_v17 = vld [vmem:[%s365_s9] sm:$0x1]  ;;  %v475_v18 = vshrl.u32 %v474_v16, 7  ;;  %v1669_v20 = vmov 0   ;;  %vm495_vm4 = vcmask 1043456   ;;  %vm914_vm5 = vcmask 261120  }
  0xd7   : > { %543 = vrot.lane.b32.xlu0 %v421_v3, %s1666_s29  ;;  %v431_v5 = vsel %vm426_vm1, %v421_v3, 0  ;;  %655 = vrot.lane.b32.xlu1 %v421_v3, %s1667_s27  ;;  %v419_v6 = vpack.c.bf16 %v418_v4, %v418_v4  ;;  %vm425_vm2 = vcmp.eq.s32.totalorder %v424_v17, 0  ;;  %v422_v52 = vld [vmem:[%s357_s28] sm:$0xff]  ;;  %s1670_s16 = smov 8   ;;  %s1671_s1 = smov 16   ;;  %vm888_vm6 = vcmask 130048  }
  0xd8   : > { %1198 = vmatpush3.bf16.xpose.msra.mxu0 %v431_v5  ;;  %v476_v19 = vsub.s32 0, %v475_v18  ;;  %v473_v21 = vsel %vm425_vm2, 1, %v1669_v20  ;;  %v423_v53 = vpack.c.bf16 %v422_v52, %v422_v52  ;;  %s1672_s12 = smov 24   ;;  %vm890_vm7 = vcmask 195584   ;;  %s1175_s17 = sshll.u32 %s1646_s24, 7 }
  0xd9   : > { %1203 = vmatprep.subr.bf16.mxu0 %v1664_v0  ;;  %s415_s4 = scalar_lea.vmem [#allocation13], %s1970_s15  ;;  %s2076_s8 = scalar_lea.hbm %s2132_s6, %s1175_s17 }
  0xda   : > { %v477_v22 = vrot.slane %v473_v21, %v476_v19  ;;  %v497_v54 = vsel %vm495_vm4, %v423_v53, 0  ;;  %s980_s23 = sshll.u32 %s415_s4, 4  ;;  %s966_s24 = scalar_lea.sflag [#allocation4], %s1967_s18  ;;  %s2078_s23 = int_to_ptr.vmem [resolvable:$true] %s980_s23 }
  0xdb   : > { %540 = vrot.lane.b32.xlu0 %v419_v6, %s1666_s29  ;;  %653 = vrot.lane.b32.xlu1 %v419_v6, %s1667_s27  ;;  %s1556_s15 = scalar_lea.vmem %s2078_s23, 128  ;;  %p2180_p1 = scmp.ne.s32.totalorder %s2161_s14, 0 }
  0xdc   : > { %vm478_vm3 = vcmp.eq.s32.totalorder %v477_v22, 1  ;;  %p1557_p6 = scmp.ne.s32.totalorder %s2078_s23, %s1556_s15  ;;  %s1673_s20 = smov [#allocation13]  }
  0xdd   : > { %s1560_s7 = sshll.u32 %s1673_s20, 4  ;;  %s1561_s7 = int_to_ptr.vmem [resolvable:$false] %s1560_s7 }
  0xde   : > { %p1558_p8 = pnand %p1557_p6, %p2180_p1  ;;  %s1562_s19 = scalar_lea.vmem %s1561_s7, 256 }
  0xdf   : > { %1200 = vmatmul.mubr.msk.bf16.vlgmr.msra.gmra.mrb[0].mxu0 %vm426_vm1, %v419_v6  ;;  %766 = vrot.lane.b32.xlu0 %v421_v3, %s1668_s13  ;;  %p1563_p13 = scmp.lt.s32.totalorder %s2078_s23, %s1561_s7  ;;  %p1564_p12 = scmp.lt.s32.totalorder %s1562_s19, %s1556_s15 }
  0xe0   : > { %764 = vrot.lane.b32.xlu1 %v419_v6, %s1668_s13  ;;  %1205 = vmatprep.mubr.msk.bf16.mxu0 %vm1665_vm0, %v1664_v0  ;;  %p1559_p0 = pneg %p1558_p8 }
  0xe1   : > { %1204 = vmatpush3.bf16.msra.mxu0 %v497_v54  ;;  %p1565_p2 = por %p1564_p12, %p1563_p13 }
  0xe2   : > { %1215 = vmatprep.subr.bf16.mxu0 %v1664_v0 }
  0xe3   : > { %p1566_p4 = pnand %p1565_p2, %p1559_p0 }
 0x149   : > { %v544_v7 = vpop.permute.xlu0 %543  ;;  %v656_v9 = vpop.permute.xlu1 %655 }
 0x14a   : > { %v549_v8 = vsel %vm426_vm1, %v544_v7, 0  ;;  %v661_v11 = vsel %vm426_vm1, %v656_v9, 0 }
 0x14b   : > { %1210 = vmatpush3.bf16.xpose.msra.mxu1 %v549_v8 }
 0x14c   : > { %1221 = vmatprep.subr.bf16.mxu1 %v1664_v0 }
 0x14d   : > { %v541_v10 = vpop.permute.xlu0 %540  ;;  %v654_v13 = vpop.permute.xlu1 %653 }
 0x151   : > { %v767_v12 = vpop.permute.xlu0 %766 }
 0x152   : > { %1212 = vmatmul.mubr.msk.bf16.vlgmr.msra.gmra.mrb[0].mxu1 %vm426_vm1, %v541_v10  ;;  %v772_v14 = vsel %vm426_vm1, %v767_v12, 0  ;;  %v765_v15 = vpop.permute.xlu1 %764 }
 0x153   : > { %1222 = vmatpush3.bf16.xpose.msra.mxu1 %v661_v11  ;;  %1223 = vmatprep.mubr.msk.bf16.mxu1 %vm1665_vm0, %v1664_v0 }
 0x154   : > { %1233 = vmatprep.subr.bf16.mxu1 %v1664_v0 }
 0x15a   : > { %1224 = vmatmul.mubr.msk.bf16.vlgmr.msra.gmra.mrb[4].mxu1 %vm426_vm1, %v654_v13 }
 0x15b   : > { %1234 = vmatpush3.bf16.xpose.msra.mxu1 %v772_v14  ;;  %1235 = vmatprep.mubr.msk.bf16.mxu1 %vm1665_vm0, %v1664_v0 }
 0x15c   : > { %1245 = vmatprep.subr.bf16.mxu1 %v1664_v0 }
 0x162   : > { %1236 = vmatmul.mubr.msk.bf16.vlgmr.msra.gmra.mrb[8].mxu1 %vm426_vm1, %v765_v15 }
 0x163   : > { %1249 = vmatprep.mubr.msk.bf16.mxu1 %vm1665_vm0, %v1664_v0 }
 0x1b2   : > { %v467_v23 = vpop.f32.mrb[0].mxu0 }
 0x1b3   : > { %v479_v24 = vsel %vm478_vm3, -1e+20, %v467_v23  ;;  %v1201_v25 = vpop.f32.mrb[1].mxu0 }
 0x1b4   : > { %v480_v26 = vsel %vm426_vm1, %v479_v24, -inf  ;;  %v470_v27 = vpop.f32.mrb[2].mxu0 }
 0x1b5   : > { %481 = vmax.xlane.f32.xlu0 %v480_v26  ;;  %v1202_v28 = vpop.f32.mrb[3].mxu0 }
 0x225   : > { %v585_v29 = vpop.f32.mrb[0].mxu1 }
 0x226   : > { %v591_v30 = vsel %vm478_vm3, -1e+20, %v585_v29  ;;  %v1213_v31 = vpop.f32.mrb[1].mxu1 }
 0x227   : > { %v588_v32 = vpop.f32.mrb[2].mxu1  ;;  %v592_v33 = vsel %vm426_vm1, %v591_v30, -inf }
 0x228   : > { %593 = vmax.xlane.f32.xlu1 %v592_v33  ;;  %v1214_v34 = vpop.f32.mrb[3].mxu1  ;;  %v1362_v33 = vld [vmem:[#allocation10] sm:$0xff]  }
 0x229   : > { %v919_v34 = vsel %vm914_vm5, %v1362_v33, 0 }
 0x22a   : > { %1246 = vmatpush3.bf16.xpose.msra.mxu1 %v919_v34 }
 0x22b   : > { %1247 = vmatprep.subr.bf16.mxu1 %v1664_v0 }
 0x22d   : > { %v697_v35 = vpop.f32.mrb[4].mxu1 }
 0x22e   : > { %v703_v36 = vsel %vm478_vm3, -1e+20, %v697_v35  ;;  %v1225_v37 = vpop.f32.mrb[5].mxu1  ;;  %v1363_v35 = vld [vmem:[#allocation10 + $0x8] sm:$0xff]  }
 0x22f   : > { %v700_v38 = vpop.f32.mrb[6].mxu1  ;;  %v704_v39 = vsel %vm426_vm1, %v703_v36, -inf }
 0x230   : > { %v1226_v40 = vpop.f32.mrb[7].mxu1  ;;  %705 = vmax.xlane.f32.xlu0 %v704_v39 }
 0x235   : > { %v808_v41 = vpop.f32.mrb[8].mxu1 }
 0x236   : > { %v814_v42 = vsel %vm478_vm3, -1e+20, %v808_v41  ;;  %v1237_v43 = vpop.f32.mrb[9].mxu1 }
 0x237   : > { %v811_v44 = vpop.f32.mrb[10].mxu1  ;;  %v815_v45 = vsel %vm426_vm1, %v814_v42, -inf }
 0x238   : > { %v1238_v46 = vpop.f32.mrb[11].mxu1  ;;  %816 = vmax.xlane.f32.xlu0 %v815_v45 }
 0x242   : > { %v482_v47 = vpop.xlane.xlu0 %481 }
 0x243   : > { %v483_v48 = vsub.f32 %v479_v24, %v482_v47 }
 0x245   : > { %v484_v49 = vmul.f32 1.442695, %v483_v48 }
 0x247   : > { %1364 = vpow2.f32 %v484_v49 }
 0x251   : > { %v1365_v50 = vpop.eup %1364 }
 0x252   : > { %v486_v51 = vsel %vm426_vm1, %v1365_v50, 0.0 }
 0x253   : > { %487 = vadd.xlane.f32.xlu1 %v486_v51 }
 0x264   : > { %605 = vrot.lane.b32.xlu1 %v423_v53, %s1666_s29 }
 0x2b5   : > { %v594_v55 = vpop.xlane.xlu1 %593 }
 0x2b6   : > { %v595_v56 = vsub.f32 %v591_v30, %v594_v55  ;;  %v1170_v55 = vld [vmem:[#allocation11] ss:$0 sm:$0xff] }
 0x2b8   : > { %v596_v57 = vmul.f32 1.442695, %v595_v56 }
 0x2ba   : > { %1366 = vpow2.f32 %v596_v57 }
 0x2bd   : > { %v706_v58 = vpop.xlane.xlu0 %705 }
 0x2be   : > { %v707_v59 = vsub.f32 %v703_v36, %v706_v58  ;;  %v922_v36 = vsel %vm914_vm5, %v1363_v35, 0 }
 0x2bf   : > { %1248 = vmatpush3.bf16.xpose.msra.mxu1 %v922_v36 }
 0x2c0   : > { %v708_v60 = vmul.f32 1.442695, %v707_v59 }
 0x2c2   : > { %1368 = vpow2.f32 %v708_v60 }
 0x2c4   : > { %v1367_v61 = vpop.eup %1366 }
 0x2c5   : > { %v817_v62 = vpop.xlane.xlu0 %816  ;;  %v598_v63 = vsel %vm426_vm1, %v1367_v61, 0.0 }
 0x2c6   : > { %v818_v1 = vsub.f32 %v814_v42, %v817_v62  ;;  %599 = vadd.xlane.f32.xlu0 %v598_v63 }
 0x2c8   : > { %v819_v2 = vmul.f32 1.442695, %v818_v1 }
 0x2ca   : > { %1370 = vpow2.f32 %v819_v2 }
 0x2cc   : > { %v1369_v3 = vpop.eup %1368 }
 0x2cd   : > { %v710_v4 = vsel %vm426_vm1, %v1369_v3, 0.0 }
 0x2ce   : > { %711 = vadd.xlane.f32.xlu1 %v710_v4 }
 0x2d4   : > { %v1371_v5 = vpop.eup %1370 }
 0x2d5   : > { %v821_v6 = vsel %vm426_vm1, %v1371_v5, 0.0 }
 0x2d6   : > { %822 = vadd.xlane.f32.xlu0 %v821_v6 }
 0x2df   : > { %827 = vrot.lane.b32.xlu1 %v423_v53, %s1668_s13 }
 0x2e0   : > { %v488_v7 = vpop.xlane.xlu1 %487 }
 0x2e1   : > { %1372 = vrcp.f32 %v488_v7 }
 0x2e4   : > { %v606_v9 = vpop.permute.xlu1 %605 }
 0x2e5   : > { %v611_v12 = vsel %vm495_vm4, %v606_v9, 0 }
 0x2eb   : > { %v1373_v8 = vpop.eup %1372 }
 0x2ec   : > { %v490_v10 = vmul.f32 %v1373_v8, %v1365_v50  ;;  %716 = vrot.lane.b32.xlu0 %v423_v53, %s1667_s27 }
 0x2ee   : > { %v491_v11 = vpack.c.bf16 %v490_v10, %v490_v10 }
 0x2f0   : > { %1206 = vmatmul.mubr.msk.bf16.vlgmr.msra.gmra.mrb[4].mxu0 %vm426_vm1, %v491_v11 }
 0x2f1   : > { %1216 = vmatpush3.bf16.msra.mxu0 %v611_v12  ;;  %1217 = vmatprep.mubr.msk.bf16.mxu0 %vm1665_vm0, %v1664_v0 }
 0x2f2   : > { %1227 = vmatprep.subr.bf16.mxu0 %v1664_v0 }
 0x353   : > { %v600_v13 = vpop.xlane.xlu0 %599 }
 0x354   : > { %1374 = vrcp.f32 %v600_v13 }
 0x35b   : > { %v712_v14 = vpop.xlane.xlu1 %711 }
 0x35c   : > { %1376 = vrcp.f32 %v712_v14 }
 0x35e   : > { %v1375_v15 = vpop.eup %1374 }
 0x35f   : > { %v602_v16 = vmul.f32 %v1375_v15, %v1367_v61  ;;  %v828_v22 = vpop.permute.xlu1 %827 }
 0x360   : > { %v833_v25 = vsel %vm495_vm4, %v828_v22, 0 }
 0x361   : > { %v603_v17 = vpack.c.bf16 %v602_v16, %v602_v16 }
 0x363   : > { %1218 = vmatmul.mubr.msk.bf16.vlgmr.msra.gmra.mrb[8].mxu0 %vm426_vm1, %v603_v17  ;;  %v823_v18 = vpop.xlane.xlu0 %822 }
 0x364   : > { %1378 = vrcp.f32 %v823_v18  ;;  %1229 = vmatprep.mubr.msk.bf16.mxu0 %vm1665_vm0, %v1664_v0 }
 0x366   : > { %v1377_v19 = vpop.eup %1376 }
 0x367   : > { %v714_v20 = vmul.f32 %v1377_v19, %v1369_v3  ;;  %v717_v21 = vpop.permute.xlu0 %716 }
 0x368   : > { %v722_v23 = vsel %vm495_vm4, %v717_v21, 0 }
 0x369   : > { %1228 = vmatpush3.bf16.msra.mxu0 %v722_v23  ;;  %v715_v24 = vpack.c.bf16 %v714_v20, %v714_v20 }
 0x36a   : > { %1239 = vmatprep.subr.bf16.mxu0 %v1664_v0 }
 0x36c   : > { %1230 = vmatmul.mubr.msk.bf16.vlgmr.msra.gmra.mrb[12].mxu0 %vm426_vm1, %v715_v24 }
 0x36d   : > { %1240 = vmatpush3.bf16.msra.mxu0 %v833_v25  ;;  %1241 = vmatprep.mubr.msk.bf16.mxu0 %vm1665_vm0, %v1664_v0 }
 0x36e   : > { %v1379_v26 = vpop.eup %1378 }
 0x36f   : > { %v825_v27 = vmul.f32 %v1379_v26, %v1371_v5 }
 0x371   : > { %v826_v28 = vpack.c.bf16 %v825_v27, %v825_v27 }
 0x374   : > { %1242 = vmatmul.mubr.msk.bf16.vlgmr.msra.gmra.mrb[16].mxu0 %vm426_vm1, %v826_v28 }
 0x3c3   : > { %v533_v29 = vpop.f32.mrb[4].mxu0 }
 0x3c4   : > { %v1207_v30 = vpop.f32.mrb[5].mxu0 }
 0x3c5   : > { %v536_v31 = vpop.f32.mrb[6].mxu0 }
 0x3c6   : > { %v1208_v32 = vpop.f32.mrb[7].mxu0 }
 0x436   : > { %v647_v37 = vpop.f32.mrb[8].mxu0 }
 0x437   : > { %876 = vrot.lane.b32.xlu1 %v647_v37, %s1670_s16  ;;  %v1219_v38 = vpop.f32.mrb[9].mxu0 }
 0x438   : > { %v650_v39 = vpop.f32.mrb[10].mxu0 }
 0x439   : > { %v1220_v40 = vpop.f32.mrb[11].mxu0 }
 0x43f   : > { %v758_v41 = vpop.f32.mrb[12].mxu0 }
 0x440   : > { %880 = vrot.lane.b32.xlu0 %v758_v41, %s1671_s1  ;;  %v1231_v42 = vpop.f32.mrb[13].mxu0 }
 0x441   : > { %v761_v43 = vpop.f32.mrb[14].mxu0 }
 0x442   : > { %v1232_v44 = vpop.f32.mrb[15].mxu0 }
 0x447   : > { %v869_v45 = vpop.f32.mrb[16].mxu0 }
 0x448   : > { %884 = vrot.lane.b32.xlu1 %v869_v45, %s1672_s12  ;;  %v1243_v0 = vpop.f32.mrb[17].mxu0 }
 0x449   : > { %v872_v46 = vpop.f32.mrb[18].mxu0 }
 0x44a   : > { %v1244_v47 = vpop.f32.mrb[19].mxu0 }
 0x4a9   : > { %v877_v48 = vpop.permute.xlu1 %876 }
 0x4aa   : > { %v887_v50 = vsel %vm426_vm1, %v533_v29, %v877_v48 }
 0x4b2   : > { %v881_v49 = vpop.permute.xlu0 %880 }
 0x4b3   : > { %v889_v51 = vsel %vm888_vm6, %v887_v50, %v881_v49 }
 0x4ba   : > { %v885_v52 = vpop.permute.xlu1 %884 }
 0x4bb   : > { %v891_v53 = vsel %vm890_vm7, %v889_v51, %v885_v52 }
 0x4bc   : > { %v892_v54 = vpack.c.bf16 %v891_v53, %v891_v53 }
 0x4be   : > { %1250 = vmatmul.mubr.msk.bf16.vlgmr.msra.gmra.mrb[12].mxu1 %vm914_vm5, %v892_v54 }
 0x591   : > { %v958_v56 = vpop.f32.mrb[12].mxu1 }
 0x592   : > { %v959_v57 = vadd.f32 %v1170_v55, %v958_v56  ;;  %v1251_v58 = vpop.f32.mrb[13].mxu1 }
 0x593   : > { %v961_v59 = vpop.f32.mrb[14].mxu1 }
 0x594   : > { %v1252_v60 = vpop.f32.mrb[15].mxu1  ;;  %964 = vst.msk [vmem:[%s415_s4] sm:$0xff] %vm914_vm5, %v959_v57 }
 0x595   : > { %1569 = shalt.err (!%p1566_p4)
}
 0x596   : > { %s1570_s18 = scalar_lea.hbm %s2076_s8, 128  ;;  %s1574_s10 = scalar_lea.hbm %s2132_s6, 256 }
 0x597   : > { %p1571_p9 = scmp.ne.s32.totalorder %s2076_s8, %s1570_s18  ;;  %p1575_p10 = scmp.lt.u32.totalorder %s2076_s8, %s2132_s6 }
 0x598   : > { %p1576_p3 = scmp.lt.u32.totalorder %s1574_s10, %s1570_s18  ;;  %p1578_p6 = scmp.lt.u32.totalorder %s1570_s18, %s2076_s8 }
 0x599   : > { %p1572_p7 = pnand %p1571_p9, %p2180_p1 }
 0x59a   : > { %p1577_p11 = por %p1576_p3, %p1575_p10 }
 0x59b   : > { %p1573_p5 = pneg %p1572_p7 }
 0x59c   : > { %p1579_p8 = por %p1578_p6, %p1577_p11 }
 0x59e   : > { %p1580_p0 = pnand %p1579_p8, %p1573_p5 }
 0x5a0   : > { %1583 = shalt.err (!%p1580_p0)
}
 0x5a1   : > { %1269 = dma.vmem_to_hbm [thread:$0]  (%p2180_p1), %s2078_s23, 128, %s2076_s8, %s966_s24  }
 0x5a2 PF: > { %s2181_s27 = sld [smem:[#allocation20_spill]]  ;;  %s2182_s13 = sld [smem:[#allocation22_spill]] }
 0x5a3   : > { %p2184_p12 = scmp.ge.s32.totalorder %s1654_s26, 2 }
 0x5a8   : > { %s992_s16 = sand.u32 1, %s2181_s27   ;;  %p2183_p13 = scmp.ne.s32.totalorder %s2182_s13, 0 }
 0x5a9   : > { %s993_s1 = scalar_lea.sflag [#allocation4], %s992_s16 }
 0x5aa   : > { %p1292_p2 = pnand %p2184_p12, %p2183_p13 }
 0x5ac   : > { %1629 = dma.done.wait (!%p1292_p2), %s993_s1, 128  }
 0x5ad   : > { %1631 = vsyncadd (!%p1292_p2), %s993_s1, 4294967168  ;;  %s29_s26 = sadd.s32 1, %s1654_s26   ;;  %s2185_s12 = sld [smem:[#allocation21_spill]] }
 0x5ae   : > { %p26_p4 = scmp.ge.s32.totalorder %s29_s26, 4   ;;  %s2186_s23 = sld [smem:[#allocation24_spill]] }
 0x5af   : > { %s2187_s14 = sld [smem:[#allocation23_spill]]  ;;  %s2188_s21 = smov %s1638_s22 }
 0x5b0   : > { %s2190_s24 = smov %s1650_s25  ;;  %28 = sbr.rel (!%p26_p4) target bundleno = 14 (0xe), region = 134 }
 0x5b3   : > { %s2189_s22 = smov %s2185_s12 }
 0x5b5   : > { %s2191_s25 = smov %s2187_s14 }
 0x5b7   :  { %998 = vsyncpa [#allocation3], 1 }
 0x5b8   :  { %1000 = vsyncpa [#allocation3 + $0x1], 1 }
 0x5b9   :  { %1001 = vsyncpa [#allocation6], 1 }
 0x5ba   :  { %1003 = vsyncpa [#allocation6 + $0x1], 1 }
 0x5bb   :  { %1004 = vsyncpa [#allocation9], 1 }
 0x5bc   :  { %1006 = vsyncpa [#allocation9 + $0x1], 1 }
 0x5bd   :  { %1007 = vsyncpa [#allocation12], 1 }
 0x5be   :  { %1008 = vsyncpa [#allocation4], 1 }
 0x5bf   :  { %1010 = vsyncpa [#allocation4 + $0x1], 1 }

</bundles_post_ra>
